<compile_context>
chip_gen: v5e
topology: v5e:2x2
jax: 0.10.0
libtpu: 0.0.40
codegen_flags: <defaults>
</compile_context>

<pallas_src>
import jax
import jax.numpy as jnp
from jax.experimental import pallas as pl
from jax.experimental.pallas import tpu as pltpu

NUM_NEURONS = 128


def _cdiv(a, b):
    return -(-a // b)


def _round_up(n, m):
    return ((n + m - 1) // m) * m


def _choose_batch_tile(B, block_b):
    """Batch tile (lane dim of the feature-major blocks)."""
    if B <= 256:
        # Single full-extent tile: any lane width equal to the full array dim
        # is legal, and at this size megacore/pipelining don't matter.
        return _round_up(B, 8)
    # Aim for >= 4 grid steps (2 TensorCores x double buffering on v7x) without
    # exceeding block_b rows per step; keep tiles 128-aligned so input loads
    # and output stores are fully lane-dense / unmasked.
    steps = max(4, _cdiv(B, block_b))
    tb = _round_up(_cdiv(B, steps), 128)
    return min(tb, _round_up(block_b, 128))


def qnet_kernel(xt_ref, w1t_ref, b1_ref, w2t_ref, b2_ref, w3_ref, b3_ref,
                out_ref):
    # Feature-major: features on sublanes, batch on lanes.
    xt = xt_ref[...].astype(jnp.bfloat16)                       # (S+A, tb)

    # fc1: single K = S+A matmul (the concat is folded into the packed input).
    h1 = jnp.dot(w1t_ref[...], xt, preferred_element_type=jnp.float32)
    h1 = jnp.maximum(h1 + b1_ref[...], 0.0)                     # (128, tb) f32

    # fc2 on the MXU (bf16 operands, f32 accumulation).
    h2 = jnp.dot(w2t_ref[...], h1.astype(jnp.bfloat16),
                 preferred_element_type=jnp.float32)
    h2 = jnp.maximum(h2 + b2_ref[...], 0.0)                     # (128, tb) f32

    # fc3 (128 -> 1) off the MXU: VPU scale by the f32 w3 column, then an XLU
    # sublane reduction that lands directly in a lane-dense (1, tb) row.
    q = jnp.sum(h2 * w3_ref[...], axis=0, keepdims=True) + b3_ref[...]
    out_ref[...] = q.astype(out_ref.dtype)                      # (1, tb)


def qnet_forward(state, action, params, *, block_b=1024):
    """Fused QNet forward. state: (B, S) f32, action: (B, A) f32 -> (B, 1) f32."""
    w1, b1, w2, b2, w3, b3 = params
    B, state_dim = state.shape
    action_dim = action.shape[1]
    in_dim = state_dim + action_dim

    # Feature-major weights / biases (tiny one-time casts & reshapes).
    w1_t = jnp.transpose(w1).astype(jnp.bfloat16)               # (128, S+A)
    w2_t = jnp.transpose(w2).astype(jnp.bfloat16)               # (128, 128)
    b1_c = b1.reshape(NUM_NEURONS, 1).astype(jnp.float32)       # (128, 1)
    b2_c = b2.reshape(NUM_NEURONS, 1).astype(jnp.float32)       # (128, 1)
    w3_c = w3.reshape(NUM_NEURONS, 1).astype(jnp.float32)       # (128, 1) f32
    b3_s = b3.reshape(1, 1).astype(jnp.float32)                 # (1, 1)

    # Pack [state | action] once, feature-major, in f32.  The bf16 cast for the
    # MXU happens inside the kernel, so this is the only wrapper-side pass.
    xt = jnp.concatenate([state, action], axis=1).astype(jnp.float32).T  # (S+A, B)

    tb = _choose_batch_tile(B, block_b)
    bp = _round_up(B, tb)
    if bp != B:
        xt = jnp.pad(xt, ((0, 0), (0, bp - B)))
    grid = (bp // tb,)

    def resident(arr):  # weights/biases: same (0, 0) block every grid step.
        return pl.BlockSpec(arr.shape, lambda i: (0, 0))

    out = pl.pallas_call(
        qnet_kernel,
        out_shape=jax.ShapeDtypeStruct((1, bp), jnp.float32),
        grid=grid,
        in_specs=[
            pl.BlockSpec((in_dim, tb), lambda i: (0, i)),   # packed activations
            resident(w1_t), resident(b1_c),
            resident(w2_t), resident(b2_c),
            resident(w3_c), resident(b3_s),
        ],
        out_specs=pl.BlockSpec((1, tb), lambda i: (0, i)),  # lane-dense q row
        compiler_params=pltpu.CompilerParams(
            dimension_semantics=("parallel",),              # megacore on v7x
        ),
    )(xt, w1_t, b1_c, w2_t, b2_c, w3_c, b3_s)

    return out[0, :B].reshape(B, 1)


def init_qnet_params(key, state_dim, action_dim):
    """Deterministic synthetic init (PyTorch-Linear-style uniform bounds)."""
    in_dim = state_dim + action_dim
    ks = jax.random.split(key, 6)

    def lin(kw, kb, fan_in, fan_out):
        bound = 1.0 / jnp.sqrt(jnp.float32(fan_in))
        w = jax.random.uniform(kw, (fan_in, fan_out), jnp.float32, -bound, bound)
        b = jax.random.uniform(kb, (1, fan_out), jnp.float32, -bound, bound)
        return w, b

    w1, b1 = lin(ks[0], ks[1], in_dim, NUM_NEURONS)
    w2, b2 = lin(ks[2], ks[3], NUM_NEURONS, NUM_NEURONS)
    w3, b3 = lin(ks[4], ks[5], NUM_NEURONS, 1)
    return (w1, b1, w2, b2, w3, b3)


def qnet_reference(state, action, params):
    """Plain-JAX f32 reference for correctness checking."""
    w1, b1, w2, b2, w3, b3 = params
    x = jnp.concatenate([state, action], axis=1)
    h1 = jnp.maximum(x @ w1 + b1, 0.0)
    h2 = jnp.maximum(h1 @ w2 + b2, 0.0)
    return h2 @ w3 + b3


if __name__ == "__main__":
    key = jax.random.PRNGKey(0)
    k_params, k_state, k_action = jax.random.split(key, 3)

    batch, state_dim, action_dim = 8, 8, 4
    params = init_qnet_params(k_params, state_dim, action_dim)
    state = jax.random.normal(k_state, (batch, state_dim), jnp.float32)
    action = jax.random.normal(k_action, (batch, action_dim), jnp.float32)

    q = qnet_forward(state, action, params)
    jax.block_until_ready(q)

    q_ref = qnet_reference(state, action, params)
    assert q.shape == (batch, 1), q.shape
    # fc1/fc2 use bf16 MXU operands (f32 accumulation) -> looser tolerance vs f32.
    assert jnp.allclose(q, q_ref, atol=5e-2, rtol=5e-2), "mismatch vs reference"

    print("KERNEL_OK")
</pallas_src>

<mosaic_0001>
module attributes {stable_mosaic.version = 11 : i64} {
  func.func @qnet_kernel(%arg0: i32, %arg1: memref<12x8xf32, #tpu.memory_space<vmem>>, %arg2: memref<128x12xbf16, #tpu.memory_space<vmem>>, %arg3: memref<128x1xf32, #tpu.memory_space<vmem>>, %arg4: memref<128x128xbf16, #tpu.memory_space<vmem>>, %arg5: memref<128x1xf32, #tpu.memory_space<vmem>>, %arg6: memref<128x1xf32, #tpu.memory_space<vmem>>, %arg7: memref<1x1xf32, #tpu.memory_space<vmem>>, %arg8: memref<1x8xf32, #tpu.memory_space<vmem>>) attributes {dimension_semantics = [#tpu.dimension_semantics<parallel>], iteration_bounds = array<i64: 1>, scalar_prefetch = 0 : i64, scratch_operands = 0 : i64, tpu.core_type = #tpu.core_type<tc>, window_params = [{transform_indices = @transform_0, window_bounds = array<i64: 12, 8>}, {pipeline_mode = #tpu.pipeline_mode<synchronous>, transform_indices = @transform_1, window_bounds = array<i64: 128, 12>}, {pipeline_mode = #tpu.pipeline_mode<synchronous>, transform_indices = @transform_2, window_bounds = array<i64: 128, 1>}, {pipeline_mode = #tpu.pipeline_mode<synchronous>, transform_indices = @transform_3, window_bounds = array<i64: 128, 128>}, {pipeline_mode = #tpu.pipeline_mode<synchronous>, transform_indices = @transform_4, window_bounds = array<i64: 128, 1>}, {pipeline_mode = #tpu.pipeline_mode<synchronous>, transform_indices = @transform_5, window_bounds = array<i64: 128, 1>}, {pipeline_mode = #tpu.pipeline_mode<synchronous>, transform_indices = @transform_6, window_bounds = array<i64: 1, 1>}, {transform_indices = @transform_7, window_bounds = array<i64: 1, 8>}]} {
    %c0 = arith.constant 0 : index
    %c0_0 = arith.constant 0 : index
    %0 = vector.load %arg1[%c0, %c0_0] : memref<12x8xf32, #tpu.memory_space<vmem>>, vector<12x8xf32>
    %1 = arith.truncf %0 : vector<12x8xf32> to vector<12x8xbf16>
    %c0_1 = arith.constant 0 : index
    %c0_2 = arith.constant 0 : index
    %2 = vector.load %arg2[%c0_1, %c0_2] : memref<128x12xbf16, #tpu.memory_space<vmem>>, vector<128x12xbf16>
    %cst = arith.constant dense<0.000000e+00> : vector<128x8xf32>
    %3 = tpu.matmul %2, %1, %cst {dimension_numbers = #tpu.dot_dimension_numbers<[1], [0], [0], [1], [0, 0, 1, 1], [], []>} : vector<128x12xbf16>, vector<12x8xbf16>, vector<128x8xf32> -> vector<128x8xf32>
    %c0_3 = arith.constant 0 : index
    %c0_4 = arith.constant 0 : index
    %4 = vector.load %arg3[%c0_3, %c0_4] : memref<128x1xf32, #tpu.memory_space<vmem>>, vector<128x1xf32>
    %5 = vector.broadcast %4 : vector<128x1xf32> to vector<128x8xf32>
    %6 = arith.addf %3, %5 : vector<128x8xf32>
    %cst_5 = arith.constant 0.000000e+00 : f32
    %7 = vector.broadcast %cst_5 : f32 to vector<128x8xf32>
    %8 = arith.maximumf %6, %7 : vector<128x8xf32>
    %c0_6 = arith.constant 0 : index
    %c0_7 = arith.constant 0 : index
    %9 = vector.load %arg4[%c0_6, %c0_7] : memref<128x128xbf16, #tpu.memory_space<vmem>>, vector<128x128xbf16>
    %10 = arith.truncf %8 : vector<128x8xf32> to vector<128x8xbf16>
    %cst_8 = arith.constant dense<0.000000e+00> : vector<128x8xf32>
    %11 = tpu.matmul %9, %10, %cst_8 {dimension_numbers = #tpu.dot_dimension_numbers<[1], [0], [0], [1], [0, 0, 1, 1], [], []>} : vector<128x128xbf16>, vector<128x8xbf16>, vector<128x8xf32> -> vector<128x8xf32>
    %c0_9 = arith.constant 0 : index
    %c0_10 = arith.constant 0 : index
    %12 = vector.load %arg5[%c0_9, %c0_10] : memref<128x1xf32, #tpu.memory_space<vmem>>, vector<128x1xf32>
    %13 = vector.broadcast %12 : vector<128x1xf32> to vector<128x8xf32>
    %14 = arith.addf %11, %13 : vector<128x8xf32>
    %cst_11 = arith.constant 0.000000e+00 : f32
    %15 = vector.broadcast %cst_11 : f32 to vector<128x8xf32>
    %16 = arith.maximumf %14, %15 : vector<128x8xf32>
    %c0_12 = arith.constant 0 : index
    %c0_13 = arith.constant 0 : index
    %17 = vector.load %arg6[%c0_12, %c0_13] : memref<128x1xf32, #tpu.memory_space<vmem>>, vector<128x1xf32>
    %18 = vector.broadcast %17 : vector<128x1xf32> to vector<128x8xf32>
    %19 = arith.mulf %16, %18 : vector<128x8xf32>
    %cst_14 = arith.constant dense<0.000000e+00> : vector<8xf32>
    %20 = vector.multi_reduction <add>, %19, %cst_14 [0] : vector<128x8xf32> to vector<8xf32>
    %21 = vector.shape_cast %20 : vector<8xf32> to vector<1x8xf32>
    %c0_15 = arith.constant 0 : index
    %c0_16 = arith.constant 0 : index
    %22 = vector.load %arg7[%c0_15, %c0_16] : memref<1x1xf32, #tpu.memory_space<vmem>>, vector<1x1xf32>
    %23 = vector.broadcast %22 : vector<1x1xf32> to vector<1x8xf32>
    %24 = arith.addf %21, %23 : vector<1x8xf32>
    %c0_17 = arith.constant 0 : index
    %c0_18 = arith.constant 0 : index
    %25 = vector.load %arg8[%c0_17, %c0_18] : memref<1x8xf32, #tpu.memory_space<vmem>>, vector<1x8xf32>
    tpu.vector_store %arg8[%c0_17, %c0_18], %24 {strides = array<i32>} : memref<1x8xf32, #tpu.memory_space<vmem>>, vector<1x8xf32>,
    return
  }
  func.func @transform_0(%arg0: i32) -> (i32, i32) {
    %c0_i32 = arith.constant 0 : i32
    %c0_i32_0 = arith.constant 0 : i32
    return %c0_i32, %arg0 : i32, i32
  }
  func.func @transform_1(%arg0: i32) -> (i32, i32) {
    %c0_i32 = arith.constant 0 : i32
    %c0_i32_0 = arith.constant 0 : i32
    %c0_i32_1 = arith.constant 0 : i32
    return %c0_i32, %c0_i32_0 : i32, i32
  }
  func.func @transform_2(%arg0: i32) -> (i32, i32) {
    %c0_i32 = arith.constant 0 : i32
    %c0_i32_0 = arith.constant 0 : i32
    %c0_i32_1 = arith.constant 0 : i32
    return %c0_i32, %c0_i32_0 : i32, i32
  }
  func.func @transform_3(%arg0: i32) -> (i32, i32) {
    %c0_i32 = arith.constant 0 : i32
    %c0_i32_0 = arith.constant 0 : i32
    %c0_i32_1 = arith.constant 0 : i32
    return %c0_i32, %c0_i32_0 : i32, i32
  }
  func.func @transform_4(%arg0: i32) -> (i32, i32) {
    %c0_i32 = arith.constant 0 : i32
    %c0_i32_0 = arith.constant 0 : i32
    %c0_i32_1 = arith.constant 0 : i32
    return %c0_i32, %c0_i32_0 : i32, i32
  }
  func.func @transform_5(%arg0: i32) -> (i32, i32) {
    %c0_i32 = arith.constant 0 : i32
    %c0_i32_0 = arith.constant 0 : i32
    %c0_i32_1 = arith.constant 0 : i32
    return %c0_i32, %c0_i32_0 : i32, i32
  }
  func.func @transform_6(%arg0: i32) -> (i32, i32) {
    %c0_i32 = arith.constant 0 : i32
    %c0_i32_0 = arith.constant 0 : i32
    %c0_i32_1 = arith.constant 0 : i32
    return %c0_i32, %c0_i32_0 : i32, i32
  }
  func.func @transform_7(%arg0: i32) -> (i32, i32) {
    %c0_i32 = arith.constant 0 : i32
    %c0_i32_0 = arith.constant 0 : i32
    return %c0_i32, %arg0 : i32, i32
  }
}

</mosaic_0001>

<bundles_post_ra>
// kernel: tpu_custom_call.1
= control target key start
LH: loop header
LB: loop body
LE: loop exit
PB: predicated region body
PF: predicated region fallthrough
CT: control target
= control target key end

     0   :  { %s1111_s0 = inlined_call_operand.vmem [shape: f32[12,8], index: 0, kind: input, shape index: {}]   ;;  %s1112_s1 = inlined_call_operand.vmem [shape: bf16[128,12], index: 1, kind: input, shape index: {}]   ;;  %s1113_s2 = inlined_call_operand.vmem [shape: f32[128,1], index: 2, kind: input, shape index: {}]   ;;  %s1114_s3 = inlined_call_operand.vmem [shape: bf16[128,128], index: 3, kind: input, shape index: {}]   ;;  %s1115_s4 = inlined_call_operand.vmem [shape: f32[128,1], index: 4, kind: input, shape index: {}]   ;;  %s1116_s5 = inlined_call_operand.vmem [shape: f32[128,1], index: 5, kind: input, shape index: {}]   ;;  %s1117_s6 = inlined_call_operand.<no memory space> [shape: f32[1,1], index: 6, kind: input, shape index: {}]   ;;  %s1118_s7 = inlined_call_operand.hbm [shape: f32[1,8], index: 7, kind: output, shape index: {}]  }
   0x1   :  { %v12_v0 = vstv %s1117_s6 }
   0x2   :  { %13 = vst [vmem:[#allocation2] sm:$0x1] %v12_v0 }
   0x3   :  { %v63_v1 = vld [vmem:[%s1113_s2 + $0x70] sm:$0xff]  ;;  %v61_v2 = vld [vmem:[%s1113_s2 + $0x60] sm:$0xff]  ;;  %v816_v4 = vmov 0   ;;  %v31_v6 = vld [vmem:[%s1111_s0 + $0x8] sm:$0xf]  ;;  %vm210_vm0 = vcmask 1045504  }
   0x4   :  { %v59_v3 = vld [vmem:[%s1113_s2 + $0x50] sm:$0xff]  ;;  %789 = vset.pattern.permute.xlu2 %v816_v4  ;;  %788 = vset.pattern.permute.xlu1 %v816_v4  ;;  %v30_v5 = vld [vmem:[%s1111_s0] sm:$0xff]  ;;  %v765_v10 = vld [vmem:[%s1112_s1 + $0x28] sm:$0xff]  ;;  %vm185_vm1 = vcmask 97280  }
   0x5   :  { %787 = vset.pattern.permute.xlu0 %v816_v4  ;;  %127 = vperm.xlu1 %788, %v61_v2   ;;  %v32_v7 = vpack.c.bf16 %v31_v6, %v30_v5  ;;  %v760_v9 = vld [vmem:[%s1112_s1] sm:$0xff]  ;;  %v62_v11 = vld [vmem:[%s1113_s2 + $0x68] sm:$0xff] }
   0x6   :  { %137 = vperm.xlu0 %787, %v63_v1   ;;  %117 = vperm.xlu2 %789, %v59_v3  }
   0x7   :  { %v212_v8 = vsel %vm210_vm0, %v32_v7, 0 }
   0x8   :  { %221 = vmatpush.bf16.msra.mxu0 %v212_v8  ;;  %776 = vmatpush.bf16.msra.mxu3 %v212_v8 }
   0x9   :  { %14 = vsyncpa [#allocation4], 0  ;;  %v64_v12 = vld [vmem:[%s1113_s2 + $0x78] sm:$0xff]  ;;  %v58_v14 = vld [vmem:[%s1113_s2 + $0x48] sm:$0xff]  ;;  %vm624_vm2 = vcmask 64512   ;;  %s679_s28 = sshll.u32 %s1118_s7, 4  ;;  %s680_s28 = int_to_ptr.hbm [resolvable:$true] %s679_s28 }
   0xa   :  { %v60_v13 = vld [vmem:[%s1113_s2 + $0x58] sm:$0xff]  ;;  %v57_v15 = vld [vmem:[%s1113_s2 + $0x40] sm:$0xff]  ;;  %v55_v16 = vld [vmem:[%s1113_s2 + $0x30] sm:$0xff]  ;;  %vm670_vm3 = vcmask 57344  }
   0xb   :  { %720 = vmatmul.msk.bf16.vlgmr.msra.gmra.mxu0 %vm185_vm1, %v760_v9  ;;  %725 = vmatmul.msk.bf16.vlgmr.msra.gmra.mxu3 %vm185_vm1, %v765_v10  ;;  %v761_v17 = vld [vmem:[%s1112_s1 + $0x8] sm:$0xff]  ;;  %v766_v18 = vld [vmem:[%s1112_s1 + $0x30] sm:$0xff]  ;;  %v53_v19 = vld [vmem:[%s1113_s2 + $0x20] sm:$0xff] }
   0xc   :  { %v56_v20 = vld [vmem:[%s1113_s2 + $0x38] sm:$0xff]  ;;  %v54_v21 = vld [vmem:[%s1113_s2 + $0x28] sm:$0xff]  ;;  %v51_v23 = vld [vmem:[%s1113_s2 + $0x10] sm:$0xff] }
   0xd   :  { %132 = vperm.xlu1 %788, %v62_v11   ;;  %v52_v22 = vld [vmem:[%s1113_s2 + $0x18] sm:$0xff]  ;;  %v49_v24 = vld [vmem:[%s1113_s2] sm:$0xff]  ;;  %v762_v25 = vld [vmem:[%s1112_s1 + $0x10] sm:$0xff] }
   0xe   :  { %142 = vperm.xlu0 %787, %v64_v12   ;;  %122 = vperm.xlu2 %789, %v60_v13   ;;  %v767_v26 = vld [vmem:[%s1112_s1 + $0x38] sm:$0xff]  ;;  %v303_v27 = vld [vmem:[%s1115_s4] sm:$0xff]  ;;  %v50_v28 = vld [vmem:[%s1113_s2 + $0x8] sm:$0xff] }
   0xf   :  { %v304_v29 = vld [vmem:[%s1115_s4 + $0x8] sm:$0xff]  ;;  %v306_v30 = vld [vmem:[%s1115_s4 + $0x18] sm:$0xff]  ;;  %v305_v31 = vld [vmem:[%s1115_s4 + $0x10] sm:$0xff] }
  0x10   :  { %v307_v32 = vld [vmem:[%s1115_s4 + $0x20] sm:$0xff]  ;;  %v763_v33 = vld [vmem:[%s1112_s1 + $0x18] sm:$0xff]  ;;  %v309_v34 = vld [vmem:[%s1115_s4 + $0x30] sm:$0xff] }
  0x11   :  { %v308_v35 = vld [vmem:[%s1115_s4 + $0x28] sm:$0xff]  ;;  %v310_v36 = vld [vmem:[%s1115_s4 + $0x38] sm:$0xff]  ;;  %v311_v38 = vld [vmem:[%s1115_s4 + $0x40] sm:$0xff] }
  0x12   :  { %v312_v37 = vld [vmem:[%s1115_s4 + $0x48] sm:$0xff]  ;;  %v313_v39 = vld [vmem:[%s1115_s4 + $0x50] sm:$0xff]  ;;  %v764_v40 = vld [vmem:[%s1112_s1 + $0x20] sm:$0xff] }
  0x13   :  { %v315_v41 = vld [vmem:[%s1115_s4 + $0x60] sm:$0xff]  ;;  %v314_v42 = vld [vmem:[%s1115_s4 + $0x58] sm:$0xff]  ;;  %v316_v43 = vld [vmem:[%s1115_s4 + $0x68] sm:$0xff] }
  0x14   :  { %v318_v44 = vld [vmem:[%s1115_s4 + $0x78] sm:$0xff]  ;;  %v317_v45 = vld [vmem:[%s1115_s4 + $0x70] sm:$0xff]  ;;  %v512_v46 = vld [vmem:[%s1116_s5] sm:$0xff] }
  0x15   :  { %112 = vperm.xlu1 %788, %v58_v14   ;;  %v514_v47 = vld [vmem:[%s1116_s5 + $0x10] sm:$0xff]  ;;  %v513_v48 = vld [vmem:[%s1116_s5 + $0x8] sm:$0xff]  ;;  %v515_v49 = vld [vmem:[%s1116_s5 + $0x18] sm:$0xff] }
  0x16   :  { %107 = vperm.xlu0 %787, %v57_v15   ;;  %97 = vperm.xlu2 %789, %v55_v16   ;;  %v517_v50 = vld [vmem:[%s1116_s5 + $0x28] sm:$0xff]  ;;  %v516_v51 = vld [vmem:[%s1116_s5 + $0x20] sm:$0xff]  ;;  %v518_v52 = vld [vmem:[%s1116_s5 + $0x30] sm:$0xff] }
  0x17   :  { %v520_v53 = vld [vmem:[%s1116_s5 + $0x40] sm:$0xff]  ;;  %v519_v54 = vld [vmem:[%s1116_s5 + $0x38] sm:$0xff]  ;;  %v521_v55 = vld [vmem:[%s1116_s5 + $0x48] sm:$0xff] }
  0x18   :  { %v523_v56 = vld [vmem:[%s1116_s5 + $0x58] sm:$0xff]  ;;  %v522_v57 = vld [vmem:[%s1116_s5 + $0x50] sm:$0xff]  ;;  %v524_v58 = vld [vmem:[%s1116_s5 + $0x60] sm:$0xff] }
  0x19   :  { %v526_v61 = vld [vmem:[%s1116_s5 + $0x70] sm:$0xff]  ;;  %v525_v62 = vld [vmem:[%s1116_s5 + $0x68] sm:$0xff]  ;;  %v527_v63 = vld [vmem:[%s1116_s5 + $0x78] sm:$0xff] }
  0x1a   :  { %v662_v2 = vld [vmem:[#allocation2] sm:$0x1] }
  0x1b   :  { %721 = vmatmul.msk.bf16.gmra.mxu0 %vm185_vm1, %v761_v17  ;;  %726 = vmatmul.msk.bf16.gmra.mxu3 %vm185_vm1, %v766_v18 }
  0x1d   :  { %87 = vperm.xlu1 %788, %v53_v19  }
  0x1e   :  { %102 = vperm.xlu0 %787, %v56_v20   ;;  %92 = vperm.xlu2 %789, %v54_v21  }
  0x25   :  { %82 = vperm.xlu1 %788, %v52_v22  }
  0x26   :  { %77 = vperm.xlu0 %787, %v51_v23   ;;  %67 = vperm.xlu2 %789, %v49_v24  }
  0x2b   :  { %722 = vmatmul.msk.bf16.gmra.mxu0 %vm185_vm1, %v762_v25  ;;  %727 = vmatmul.msk.bf16.gmra.mxu3 %vm185_vm1, %v767_v26 }
  0x2d   :  { %321 = vperm.xlu1 %788, %v303_v27  }
  0x2e   :  { %72 = vperm.xlu0 %787, %v50_v28   ;;  %326 = vperm.xlu2 %789, %v304_v29  }
  0x35   :  { %336 = vperm.xlu1 %788, %v306_v30  }
  0x36   :  { %331 = vperm.xlu0 %787, %v305_v31   ;;  %341 = vperm.xlu2 %789, %v307_v32  }
  0x3b   :  { %723 = vmatmul.msk.bf16.gmra.mxu0 %vm185_vm1, %v763_v33 }
  0x3d   :  { %351 = vperm.xlu1 %788, %v309_v34  }
  0x3e   :  { %346 = vperm.xlu0 %787, %v308_v35   ;;  %356 = vperm.xlu2 %789, %v310_v36  }
  0x45   :  { %366 = vperm.xlu1 %788, %v312_v37  }
  0x46   :  { %361 = vperm.xlu0 %787, %v311_v38   ;;  %371 = vperm.xlu2 %789, %v313_v39  }
  0x4b   :  { %724 = vmatmul.msk.bf16.gmra.mxu0 %vm185_vm1, %v764_v40 }
  0x4d   :  { %381 = vperm.xlu1 %788, %v315_v41  }
  0x4e   :  { %376 = vperm.xlu0 %787, %v314_v42   ;;  %386 = vperm.xlu2 %789, %v316_v43  }
  0x55   :  { %396 = vperm.xlu1 %788, %v318_v44  }
  0x56   :  { %391 = vperm.xlu0 %787, %v317_v45   ;;  %530 = vperm.xlu2 %789, %v512_v46  }
  0x5d   :  { %540 = vperm.xlu1 %788, %v514_v47  }
  0x5e   :  { %535 = vperm.xlu0 %787, %v513_v48   ;;  %545 = vperm.xlu2 %789, %v515_v49  }
  0x60   :  { %v118_v59 = vpop.permute.xlu2 %117 }
  0x65   :  { %555 = vperm.xlu1 %788, %v517_v50  }
  0x66   :  { %550 = vperm.xlu0 %787, %v516_v51   ;;  %560 = vperm.xlu2 %789, %v518_v52  }
  0x68   :  { %v123_v0 = vpop.permute.xlu2 %122 }
  0x6d   :  { %570 = vperm.xlu1 %788, %v520_v53  }
  0x6e   :  { %565 = vperm.xlu0 %787, %v519_v54   ;;  %575 = vperm.xlu2 %789, %v521_v55  }
  0x70   :  { %v98_v5 = vpop.permute.xlu2 %97 }
  0x75   :  { %585 = vperm.xlu1 %788, %v523_v56  }
  0x76   :  { %580 = vperm.xlu0 %787, %v522_v57   ;;  %590 = vperm.xlu2 %789, %v524_v58  }
  0x77   :  { %v128_v24 = vpop.permute.xlu1 %127 }
  0x78   :  { %v138_v60 = vpop.permute.xlu0 %137  ;;  %v93_v9 = vpop.permute.xlu2 %92 }
  0x7d   :  { %600 = vperm.xlu1 %788, %v526_v61  }
  0x7e   :  { %595 = vperm.xlu0 %787, %v525_v62   ;;  %605 = vperm.xlu2 %789, %v527_v63  }
  0x7f   :  { %v133_v28 = vpop.permute.xlu1 %132 }
  0x80   :  { %v143_v1 = vpop.permute.xlu0 %142  ;;  %v68_v13 = vpop.permute.xlu2 %67 }
  0x86   :  { %665 = vperm.xlu0 %787, %v662_v2  }
  0x87   :  { %v113_v46 = vpop.permute.xlu1 %112 }
  0x88   :  { %v108_v3 = vpop.permute.xlu0 %107  ;;  %v223_v4 = vpop.f32.mrf.mxu0 }
  0x89   :  { %v224_v15 = vadd.f32 %v223_v4, %v68_v13  ;;  %v771_v13 = vld [vmem:[%s1114_s3 + $0x18] sm:$0xff] }
  0x8b   :  { %v263_v19 = vmax.f32 %v224_v15, 0.0 }
  0x8e   :  { %v248_v6 = vpop.f32.mrf.mxu3 }
  0x8f   :  { %v249_v36 = vadd.f32 %v248_v6, %v118_v59  ;;  %v88_v48 = vpop.permute.xlu1 %87 }
  0x90   :  { %v103_v7 = vpop.permute.xlu0 %102  ;;  %v225_v8 = vpop.f32.mrf.mxu0 }
  0x91   :  { %v273_v41 = vmax.f32 %v249_v36, 0.0 }
  0x96   :  { %v250_v10 = vpop.f32.mrf.mxu3 }
  0x97   :  { %v251_v37 = vadd.f32 %v250_v10, %v123_v0  ;;  %v83_v61 = vpop.permute.xlu1 %82  ;;  %v773_v10 = vld [vmem:[%s1114_s3 + $0x28] sm:$0xff] }
  0x98   :  { %v78_v11 = vpop.permute.xlu0 %77  ;;  %v228_v12 = vpop.f32.mrf.mxu0 }
  0x99   :  { %v274_v42 = vmax.f32 %v251_v37, 0.0 }
  0x9b   :  { %v300_v45 = vpack.c.bf16 %v274_v42, %v273_v41 }
  0x9e   :  { %v253_v14 = vpop.f32.mrf.mxu3 }
  0x9f   :  { %v254_v30 = vadd.f32 %v253_v14, %v128_v24  ;;  %v775_v14 = vld [vmem:[%s1114_s3 + $0x38] sm:$0xff]  ;;  %v322_v15 = vpop.permute.xlu1 %321 }
  0xa0   :  { %v73_v16 = vpop.permute.xlu0 %72  ;;  %v230_v18 = vpop.f32.mrf.mxu0 }
  0xa1   :  { %v226_v17 = vadd.f32 %v225_v8, %v73_v16  ;;  %v275_v38 = vmax.f32 %v254_v30, 0.0  ;;  %v231_v62 = vadd.f32 %v230_v18, %v83_v61  ;;  %v772_v8 = vld [vmem:[%s1114_s3 + $0x20] sm:$0xff]  ;;  %v327_v16 = vpop.permute.xlu2 %326 }
  0xa3   :  { %v264_v20 = vmax.f32 %v226_v17, 0.0 }
  0xa5   :  { %v1043_v21 = vpack.c.bf16 %v264_v20, %v263_v19 }
  0xa6   :  { %v255_v22 = vpop.f32.mrf.mxu3 }
  0xa7   :  { %v256_v31 = vadd.f32 %v255_v22, %v133_v28  ;;  %v337_v18 = vpop.permute.xlu1 %336 }
  0xa8   :  { %v233_v23 = vpop.f32.mrf.mxu0  ;;  %v332_v17 = vpop.permute.xlu0 %331 }
  0xa9   :  { %v276_v39 = vmax.f32 %v256_v31, 0.0  ;;  %v234_v59 = vadd.f32 %v233_v23, %v88_v48  ;;  %v342_v19 = vpop.permute.xlu2 %341 }
  0xab   :  { %v301_v43 = vpack.c.bf16 %v276_v39, %v275_v38  ;;  %v267_v2 = vmax.f32 %v234_v59, 0.0 }
  0xae   :  { %v258_v25 = vpop.f32.mrf.mxu3 }
  0xaf   :  { %v259_v27 = vadd.f32 %v258_v25, %v138_v60 }
  0xb0   :  { %v235_v26 = vpop.f32.mrf.mxu0  ;;  %v347_v20 = vpop.permute.xlu0 %346 }
  0xb1   :  { %v277_v32 = vmax.f32 %v259_v27, 0.0  ;;  %v236_v56 = vadd.f32 %v235_v26, %v93_v9  ;;  %v769_v9 = vld [vmem:[%s1114_s3 + $0x8] sm:$0xff]  ;;  %v1071_v22 = vpop.permute.xlu2 %356 }
  0xb3   :  { %v268_v63 = vmax.f32 %v236_v56, 0.0 }
  0xb5   :  { %v297_v4 = vpack.c.bf16 %v268_v63, %v267_v2 }
  0xb6   :  { %v260_v29 = vpop.f32.mrf.mxu3 }
  0xb7   :  { %v261_v33 = vadd.f32 %v260_v29, %v143_v1  ;;  %v229_v1 = vadd.f32 %v228_v12, %v78_v11  ;;  %v770_v11 = vld [vmem:[%s1114_s3 + $0x10] sm:$0xff] }
  0xb8   :  { %v238_v35 = vpop.f32.mrf.mxu0  ;;  %v774_v12 = vld [vmem:[%s1114_s3 + $0x30] sm:$0xff]  ;;  %v362_v23 = vpop.permute.xlu0 %361 }
  0xb9   :  { %v278_v34 = vmax.f32 %v261_v33, 0.0  ;;  %v239_v53 = vadd.f32 %v238_v35, %v98_v5  ;;  %v265_v5 = vmax.f32 %v229_v1, 0.0  ;;  %v1073_v26 = vpop.permute.xlu2 %371 }
  0xbb   :  { %v302_v40 = vpack.c.bf16 %v278_v34, %v277_v32  ;;  %v269_v60 = vmax.f32 %v239_v53, 0.0 }
  0xbd   :  { %447 = vmatpush.bf16.msra.mxu1 %v302_v40  ;;  %777 = vmatpush.bf16.msra.mxu2 %v302_v40 }
  0xc0   :  { %v240_v44 = vpop.f32.mrf.mxu0  ;;  %v1075_v29 = vpop.permute.xlu0 %376 }
  0xc1   :  { %448 = vmatpush.bf16.msra.mxu1 %v301_v43  ;;  %778 = vmatpush.bf16.msra.mxu2 %v301_v43  ;;  %v241_v51 = vadd.f32 %v240_v44, %v103_v7  ;;  %v768_v7 = vld [vmem:[%s1114_s3] sm:$0xff]  ;;  %v1079_v31 = vpop.permute.xlu2 %386  ;;  %s817_s3 = smov [#allocation3]  }
  0xc2   :  { %s677_s25 = sshll.u32 %s817_s3, 4  ;;  %s678_s25 = int_to_ptr.vmem [resolvable:$true] %s677_s25 }
  0xc3   :  { %v270_v57 = vmax.f32 %v241_v51, 0.0 }
  0xc5   :  { %449 = vmatpush.bf16.msra.mxu1 %v300_v45  ;;  %779 = vmatpush.bf16.msra.mxu2 %v300_v45  ;;  %v298_v0 = vpack.c.bf16 %v270_v57, %v269_v60 }
  0xc8   :  { %v243_v47 = vpop.f32.mrf.mxu0  ;;  %v1081_v34 = vpop.permute.xlu0 %391 }
  0xc9   :  { %v244_v49 = vadd.f32 %v243_v47, %v108_v3  ;;  %v266_v3 = vmax.f32 %v231_v62, 0.0  ;;  %v531_v37 = vpop.permute.xlu2 %530 }
  0xcb   :  { %v271_v54 = vmax.f32 %v244_v49, 0.0  ;;  %v296_v6 = vpack.c.bf16 %v266_v3, %v265_v5 }
  0xd0   :  { %v245_v50 = vpop.f32.mrf.mxu0  ;;  %v536_v39 = vpop.permute.xlu0 %535 }
  0xd1   :  { %v246_v52 = vadd.f32 %v245_v50, %v113_v46  ;;  %v546_v43 = vpop.permute.xlu2 %545 }
  0xd3   :  { %v272_v55 = vmax.f32 %v246_v52, 0.0 }
  0xd5   :  { %v299_v58 = vpack.c.bf16 %v272_v55, %v271_v54 }
  0xd7   :  { %450 = vmatpush.bf16.msra.mxu1 %v299_v58  ;;  %780 = vmatpush.bf16.msra.mxu2 %v299_v58 }
  0xd8   :  { %v551_v48 = vpop.permute.xlu0 %550 }
  0xd9   :  { %v561_v56 = vpop.permute.xlu2 %560 }
  0xdb   :  { %451 = vmatpush.bf16.msra.mxu1 %v298_v0  ;;  %781 = vmatpush.bf16.msra.mxu2 %v298_v0 }
  0xdf   :  { %452 = vmatpush.bf16.msra.mxu1 %v297_v4  ;;  %782 = vmatpush.bf16.msra.mxu2 %v297_v4 }
  0xe0   :  { %v566_v5 = vpop.permute.xlu0 %565 }
  0xe3   :  { %453 = vmatpush.bf16.msra.mxu1 %v296_v6  ;;  %783 = vmatpush.bf16.msra.mxu2 %v296_v6 }
  0xe7   :  { %454 = vmatpush.bf16.msra.mxu1 %v1043_v21  ;;  %784 = vmatpush.bf16.msra.mxu2 %v1043_v21  ;;  %v352_v21 = vpop.permute.xlu1 %351 }
  0xea   :  { %455 = vmatmul.bf16.vlgmr.msra.gmra.mxu1 %v768_v7  ;;  %475 = vmatmul.bf16.vlgmr.msra.gmra.mxu2 %v772_v8 }
  0xef   :  { %v367_v25 = vpop.permute.xlu1 %366 }
  0xf7   :  { %v1077_v30 = vpop.permute.xlu1 %381 }
  0xfa   :  { %460 = vmatmul.bf16.gmra.mxu1 %v769_v9  ;;  %480 = vmatmul.bf16.gmra.mxu2 %v773_v10 }
  0xff   :  { %v1083_v35 = vpop.permute.xlu1 %396 }
 0x107   :  { %v541_v41 = vpop.permute.xlu1 %540 }
 0x10a   :  { %465 = vmatmul.bf16.gmra.mxu1 %v770_v11  ;;  %485 = vmatmul.bf16.gmra.mxu2 %v774_v12 }
 0x10f   :  { %v556_v52 = vpop.permute.xlu1 %555 }
 0x117   :  { %v571_v10 = vpop.permute.xlu1 %570 }
 0x11a   :  { %470 = vmatmul.bf16.gmra.mxu1 %v771_v13  ;;  %490 = vmatmul.bf16.gmra.mxu2 %v775_v14 }
 0x167   :  { %v456_v24 = vpop.f32.mrf.mxu1 }
 0x168   :  { %v457_v46 = vadd.f32 %v456_v24, %v322_v15  ;;  %v576_v15 = vpop.permute.xlu2 %575 }
 0x16a   :  { %v496_v53 = vmax.f32 %v457_v46, 0.0 }
 0x16c   :  { %v608_v61 = vmul.f32 %v531_v37, %v496_v53 }
 0x16d   :  { %v476_v27 = vpop.f32.mrf.mxu2 }
 0x16e   :  { %v625_v6 = vsel %vm624_vm2, %v608_v61, 0.0  ;;  %v477_v12 = vadd.f32 %v476_v27, %v362_v23 }
 0x16f   :  { %v458_v28 = vpop.f32.mrf.mxu1 }
 0x170   :  { %v459_v44 = vadd.f32 %v458_v28, %v327_v16  ;;  %v504_v28 = vmax.f32 %v477_v12, 0.0 }
 0x172   :  { %v497_v50 = vmax.f32 %v459_v44, 0.0 }
 0x174   :  { %v609_v57 = vmul.f32 %v536_v39, %v497_v50 }
 0x175   :  { %v478_v32 = vpop.f32.mrf.mxu2 }
 0x176   :  { %v626_v1 = vsel %vm624_vm2, %v609_v57, 0.0 }
 0x177   :  { %v461_v33 = vpop.f32.mrf.mxu1  ;;  %v627_v11 = vadd.f32 %v626_v1, %v625_v6 }
 0x178   :  { %v462_v47 = vadd.f32 %v461_v33, %v332_v17 }
 0x17a   :  { %v498_v54 = vmax.f32 %v462_v47, 0.0 }
 0x17c   :  { %v610_v62 = vmul.f32 %v541_v41, %v498_v54 }
 0x17d   :  { %v481_v36 = vpop.f32.mrf.mxu2 }
 0x17e   :  { %v628_v7 = vsel %vm624_vm2, %v610_v62, 0.0  ;;  %v482_v33 = vadd.f32 %v481_v36, %v1073_v26 }
 0x17f   :  { %v463_v38 = vpop.f32.mrf.mxu1  ;;  %v629_v16 = vadd.f32 %v628_v7, %v627_v11 }
 0x180   :  { %v464_v51 = vadd.f32 %v463_v38, %v337_v18  ;;  %v479_v18 = vadd.f32 %v478_v32, %v367_v25  ;;  %v581_v25 = vpop.permute.xlu0 %580  ;;  %v506_v44 = vmax.f32 %v482_v33, 0.0 }
 0x182   :  { %v499_v58 = vmax.f32 %v464_v51, 0.0  ;;  %v505_v27 = vmax.f32 %v479_v18, 0.0  ;;  %v591_v51 = vpop.permute.xlu2 %590  ;;  %v618_v53 = vmul.f32 %v581_v25, %v506_v44 }
 0x184   :  { %v611_v2 = vmul.f32 %v546_v43, %v499_v58  ;;  %v616_v43 = vmul.f32 %v571_v10, %v504_v28  ;;  %v617_v36 = vmul.f32 %v576_v15, %v505_v27 }
 0x185   :  { %v483_v40 = vpop.f32.mrf.mxu2 }
 0x186   :  { %v630_v13 = vsel %vm624_vm2, %v611_v2, 0.0  ;;  %v484_v39 = vadd.f32 %v483_v40, %v1075_v29 }
 0x187   :  { %v466_v42 = vpop.f32.mrf.mxu1 }
 0x188   :  { %v467_v55 = vadd.f32 %v466_v42, %v342_v19  ;;  %v596_v62 = vpop.permute.xlu0 %595 }
 0x18a   :  { %v500_v63 = vmax.f32 %v467_v55, 0.0  ;;  %v606_v6 = vpop.permute.xlu2 %605 }
 0x18c   :  { %v612_v8 = vmul.f32 %v551_v48, %v500_v63  ;;  %v586_v48 = vpop.permute.xlu1 %585 }
 0x18d   :  { %v486_v45 = vpop.f32.mrf.mxu2 }
 0x18e   :  { %v632_v19 = vsel %vm624_vm2, %v612_v8, 0.0  ;;  %v487_v46 = vadd.f32 %v486_v45, %v1077_v30  ;;  %v642_v30 = vsel %vm624_vm2, %v617_v36, 0.0 }
 0x18f   :  { %v468_v49 = vpop.f32.mrf.mxu1 }
 0x190   :  { %v469_v59 = vadd.f32 %v468_v49, %v347_v20  ;;  %v507_v49 = vmax.f32 %v484_v39, 0.0  ;;  %v508_v54 = vmax.f32 %v487_v46, 0.0  ;;  %v666_v18 = vpop.permute.xlu0 %665 }
 0x192   :  { %v501_v3 = vmax.f32 %v469_v59, 0.0  ;;  %v619_v45 = vmul.f32 %v586_v48, %v507_v49 }
 0x194   :  { %v613_v14 = vmul.f32 %v556_v52, %v501_v3  ;;  %v640_v52 = vsel %vm624_vm2, %v616_v43, 0.0  ;;  %v601_v3 = vpop.permute.xlu1 %600 }
 0x195   :  { %v488_v60 = vpop.f32.mrf.mxu2 }
 0x196   :  { %v634_v37 = vsel %vm624_vm2, %v613_v14, 0.0 }
 0x197   :  { %v471_v0 = vpop.f32.mrf.mxu1 }
 0x198   :  { %v472_v4 = vadd.f32 %v471_v0, %v352_v21  ;;  %v631_v21 = vadd.f32 %v630_v13, %v629_v16  ;;  %v646_v0 = vsel %vm624_vm2, %v619_v45, 0.0 }
 0x19a   :  { %v502_v9 = vmax.f32 %v472_v4, 0.0  ;;  %v633_v23 = vadd.f32 %v632_v19, %v631_v21 }
 0x19c   :  { %v614_v20 = vmul.f32 %v561_v56, %v502_v9  ;;  %v635_v32 = vadd.f32 %v634_v37, %v633_v23 }
 0x19d   :  { %v491_v17 = vpop.f32.mrf.mxu2 }
 0x19e   :  { %v636_v41 = vsel %vm624_vm2, %v614_v20, 0.0  ;;  %v492_v55 = vadd.f32 %v491_v17, %v1081_v34  ;;  %v668_v20 = vperm.slane %v666_v18, 0 }
 0x19f   :  { %v473_v24 = vpop.f32.mrf.mxu1  ;;  %v637_v26 = vadd.f32 %v636_v41, %v635_v32 }
 0x1a0   :  { %v474_v38 = vadd.f32 %v473_v24, %v1071_v22  ;;  %v489_v22 = vadd.f32 %v488_v60, %v1079_v31  ;;  %v644_v31 = vsel %vm624_vm2, %v618_v53, 0.0  ;;  %v620_v60 = vmul.f32 %v591_v51, %v508_v54 }
 0x1a1   :  { %v510_v61 = vmax.f32 %v492_v55, 0.0 }
 0x1a2   :  { %v503_v42 = vmax.f32 %v474_v38, 0.0  ;;  %v509_v57 = vmax.f32 %v489_v22, 0.0  ;;  %v648_v4 = vsel %vm624_vm2, %v620_v60, 0.0 }
 0x1a4   :  { %v615_v47 = vmul.f32 %v566_v5, %v503_v42  ;;  %v621_v1 = vmul.f32 %v596_v62, %v509_v57  ;;  %v622_v5 = vmul.f32 %v601_v3, %v510_v61 }
 0x1a5   :  { %v493_v40 = vpop.f32.mrf.mxu2 }
 0x1a6   :  { %v638_v50 = vsel %vm624_vm2, %v615_v47, 0.0  ;;  %v494_v58 = vadd.f32 %v493_v40, %v1083_v35  ;;  %v650_v35 = vsel %vm624_vm2, %v621_v1, 0.0  ;;  %v652_v10 = vsel %vm624_vm2, %v622_v5, 0.0 }
 0x1a7   :  { %v639_v29 = vadd.f32 %v638_v50, %v637_v26 }
 0x1a8   :  { %v511_v2 = vmax.f32 %v494_v58, 0.0 }
 0x1a9   :  { %v641_v56 = vadd.f32 %v640_v52, %v639_v29 }
 0x1aa   :  { %v623_v8 = vmul.f32 %v606_v6, %v511_v2 }
 0x1ab   :  { %v643_v59 = vadd.f32 %v642_v30, %v641_v56 }
 0x1ac   :  { %v654_v12 = vsel %vm624_vm2, %v623_v8, 0.0 }
 0x1ad   :  { %v645_v63 = vadd.f32 %v644_v31, %v643_v59 }
 0x1af   :  { %v647_v34 = vadd.f32 %v646_v0, %v645_v63 }
 0x1b1   :  { %v649_v7 = vadd.f32 %v648_v4, %v647_v34 }
 0x1b3   :  { %v651_v9 = vadd.f32 %v650_v35, %v649_v7 }
 0x1b5   :  { %v653_v11 = vadd.f32 %v652_v10, %v651_v9 }
 0x1b7   :  { %v655_v13 = vadd.f32 %v654_v12, %v653_v11 }
 0x1b9   :  { %v656_v14 = vrot.slane %v655_v13, 4 }
 0x1bb   :  { %v657_v15 = vadd.f32 %v656_v14, %v655_v13 }
 0x1bd   :  { %v658_v16 = vrot.slane %v657_v15, 2 }
 0x1bf   :  { %v659_v17 = vadd.f32 %v658_v16, %v657_v15 }
 0x1c1   :  { %v660_v19 = vrot.slane %v659_v17, 1 }
 0x1c3   :  { %v661_v21 = vadd.f32 %v660_v19, %v659_v17 }
 0x1c5   :  { %v669_v24 = vadd.f32 %v668_v20, %v661_v21 }
 0x1c7   :  { %671 = vst.msk [vmem:[#allocation3] sm:$0x1] %vm670_vm3, %v669_v24 }
 0x1c8   :  { %682 = dma.vmem_to_hbm [thread:$0]  %s678_s25, 16, %s680_s28, [#allocation4]  }
 0x1c9   :  { %814 = dma.done.wait [#allocation4], 16  }
 0x1ca   :  { %815 = vsyncadd [#allocation4], 4294967280 }
 0x1cb   :  { %687 = vsyncpa [#allocation4], 1 }

</bundles_post_ra>
